<compile_context>
chip_gen: v7x
topology: tpu7x:2x2x1
jax: 0.10.0
libtpu: 0.0.40
codegen_flags: <defaults>
</compile_context>

<pallas_src>
import functools

import jax
import jax.numpy as jnp
from jax.experimental import pallas as pl
from jax.experimental.pallas import tpu as pltpu


def _concat_drop_last_kernel(x1_ref, x2_ref, o_ref, *, n_x1_tiles,
                             x2_block_rows, two_phase):
    """Copies one output row-tile from either x1 or x2[:, :-1]."""
    if not two_phase:
        # N2 == 1: the torch slice in2[:, :-1] is empty, so out == x1.
        o_ref[...] = x1_ref[...]
        return

    t = pl.program_id(1)

    @pl.when(t < n_x1_tiles)
    def _copy_from_x1():
        o_ref[...] = x1_ref[...]

    @pl.when(t >= n_x1_tiles)
    def _copy_from_x2():
        if x2_block_rows == o_ref.shape[1]:
            # Full, sublane-aligned block store (steady-state case). Rows past
            # the valid output extent fall in the padded part of the last
            # block and are dropped on write-back by Pallas.
            o_ref[...] = x2_ref[...]
        else:
            # x2 is smaller than one row tile: single partial store; the
            # unwritten tail rows of this (last) block are out of bounds of
            # the output array and therefore masked away.
            o_ref[:, 0:x2_block_rows, :] = x2_ref[...]


def _pick_row_tile(n1, itemsize, max_rows=512):
    """Largest row tile <= max_rows that divides n1 and is sublane-aligned."""
    gran = max(8, 32 // max(int(itemsize), 1))  # f32->8, bf16->16, int8->32
    if n1 % gran != 0:
        raise ValueError(
            f"x1 row count {n1} must be a multiple of {gran} for this kernel")
    tile = gran
    for cand in range(gran, min(n1, max_rows) + 1, gran):
        if n1 % cand == 0:
            tile = cand
    return tile


def model_forward(x1: jax.Array, x2: jax.Array, *, max_rows_per_tile=512):
    """Equivalent of Model.forward: concat(x1, x2[:, :-1]) along dim 1."""
    b, n1, d = x1.shape
    b2, n2, d2 = x2.shape
    assert b == b2 and d == d2, "batch / feature dims must match for cat(dim=1)"
    assert x1.dtype == x2.dtype, "torch.cat requires matching dtypes"
    assert n2 >= 1

    out_n = n1 + n2 - 1
    tn = _pick_row_tile(n1, jnp.dtype(x1.dtype).itemsize, max_rows_per_tile)

    t1 = n1 // tn                                # output tiles fed by x1
    t2 = pl.cdiv(n2 - 1, tn) if n2 > 1 else 0    # output tiles fed by x2[:, :-1]
    two_phase = t2 > 0
    x2_block_rows = min(tn, n2)                  # full-dim block when x2 is tiny

    kernel = functools.partial(
        _concat_drop_last_kernel,
        n_x1_tiles=t1,
        x2_block_rows=x2_block_rows,
        two_phase=two_phase,
    )

    # Index maps: during the "other" phase keep the unused input's block index
    # constant so Pallas skips its re-fetch (no wasted HBM read traffic).
    x1_map = lambda bi, ti: (bi, jnp.minimum(ti, t1 - 1), 0)
    x2_map = lambda bi, ti: (bi, jnp.maximum(ti - t1, 0), 0)
    out_map = lambda bi, ti: (bi, ti, 0)

    return pl.pallas_call(
        kernel,
        out_shape=jax.ShapeDtypeStruct((b, out_n, d), x1.dtype),
        grid=(b, t1 + t2),
        in_specs=[
            pl.BlockSpec((1, tn, d), x1_map),
            pl.BlockSpec((1, x2_block_rows, d), x2_map),
        ],
        out_specs=pl.BlockSpec((1, tn, d), out_map),
        compiler_params=pltpu.CompilerParams(
            dimension_semantics=("parallel", "parallel"),
        ),
    )(x1, x2)


def _reference(x1, x2):
    return jnp.concatenate([x1, x2[:, : x2.shape[1] - 1]], axis=1)


if __name__ == "__main__":
    # Small, consistent shapes (the fuzzer's original shapes are astronomically
    # large and have mismatched last dims, which would not even cat in torch).
    key = jax.random.PRNGKey(0)

    test_shapes = [
        # (B, N1, N2, D)
        (2, 128, 129, 128),   # everything tile-aligned, both phases exercised
        (2, 64, 72, 128),     # padded last output block / partial x2 tail
        (1, 64, 5, 128),      # x2 smaller than one row tile
        (1, 16, 1, 128),      # N2 == 1 -> output is exactly x1
    ]

    for (bs, n1, n2, d) in test_shapes:
        k1, k2, key = jax.random.split(key, 3)
        x1 = jax.random.normal(k1, (bs, n1, d), dtype=jnp.float32)
        x2 = jax.random.normal(k2, (bs, n2, d), dtype=jnp.float32)

        out = jax.block_until_ready(model_forward(x1, x2))
        ref = _reference(x1, x2)
        assert out.shape == ref.shape, (out.shape, ref.shape)
        assert jnp.array_equal(out, ref), f"mismatch vs reference for {(bs, n1, n2, d)}"

    print("KERNEL_OK")
</pallas_src>

<mosaic_0001>
module attributes {stable_mosaic.version = 11 : i64} {
  func.func @_concat_drop_last_kernel(%arg0: i32, %arg1: i32, %arg2: memref<1x128x128xf32, #tpu.memory_space<vmem>>, %arg3: memref<1x128x128xf32, #tpu.memory_space<vmem>>, %arg4: memref<1x128x128xf32, #tpu.memory_space<vmem>>) attributes {dimension_semantics = [#tpu.dimension_semantics<parallel>, #tpu.dimension_semantics<parallel>], iteration_bounds = array<i64: 2, 2>, scalar_prefetch = 0 : i64, scratch_operands = 0 : i64, tpu.core_type = #tpu.core_type<tc>, window_params = [{transform_indices = @transform_0, window_bounds = array<i64: 1, 128, 128>}, {transform_indices = @transform_1, window_bounds = array<i64: 1, 128, 128>}, {transform_indices = @transform_2, window_bounds = array<i64: 1, 128, 128>}]} {
    %c1_i32 = arith.constant 1 : i32
    %0 = arith.cmpi slt, %arg1, %c1_i32 : i32
    %1 = arith.extui %0 : i1 to i32
    %c0_i32 = arith.constant 0 : i32
    %2 = arith.cmpi ne, %1, %c0_i32 : i32
    scf.if %2 {
      %c0 = arith.constant 0 : index
      %c0_2 = arith.constant 0 : index
      %c0_3 = arith.constant 0 : index
      %6 = vector.load %arg2[%c0, %c0_2, %c0_3] : memref<1x128x128xf32, #tpu.memory_space<vmem>>, vector<1x128x128xf32>
      %c0_4 = arith.constant 0 : index
      %c0_5 = arith.constant 0 : index
      %c0_6 = arith.constant 0 : index
      %7 = vector.load %arg4[%c0_4, %c0_5, %c0_6] : memref<1x128x128xf32, #tpu.memory_space<vmem>>, vector<1x128x128xf32>
      tpu.vector_store %arg4[%c0_4, %c0_5, %c0_6], %6 {strides = array<i32>} : memref<1x128x128xf32, #tpu.memory_space<vmem>>, vector<1x128x128xf32>,
    } else {
    }
    %c1_i32_0 = arith.constant 1 : i32
    %3 = arith.cmpi sge, %arg1, %c1_i32_0 : i32
    %4 = arith.extui %3 : i1 to i32
    %c0_i32_1 = arith.constant 0 : i32
    %5 = arith.cmpi ne, %4, %c0_i32_1 : i32
    scf.if %5 {
      %c0 = arith.constant 0 : index
      %c0_2 = arith.constant 0 : index
      %c0_3 = arith.constant 0 : index
      %6 = vector.load %arg3[%c0, %c0_2, %c0_3] : memref<1x128x128xf32, #tpu.memory_space<vmem>>, vector<1x128x128xf32>
      %c0_4 = arith.constant 0 : index
      %c0_5 = arith.constant 0 : index
      %c0_6 = arith.constant 0 : index
      %7 = vector.load %arg4[%c0_4, %c0_5, %c0_6] : memref<1x128x128xf32, #tpu.memory_space<vmem>>, vector<1x128x128xf32>
      tpu.vector_store %arg4[%c0_4, %c0_5, %c0_6], %6 {strides = array<i32>} : memref<1x128x128xf32, #tpu.memory_space<vmem>>, vector<1x128x128xf32>,
    } else {
    }
    return
  }
  func.func @transform_0(%arg0: i32, %arg1: i32) -> (i32, i32, i32) {
    %c0_i32 = arith.constant 0 : i32
    %0 = arith.minsi %arg1, %c0_i32 : i32
    %c0_i32_0 = arith.constant 0 : i32
    %c0_i32_1 = arith.constant 0 : i32
    return %arg0, %0, %c0_i32_0 : i32, i32, i32
  }
  func.func @transform_1(%arg0: i32, %arg1: i32) -> (i32, i32, i32) {
    %c1_i32 = arith.constant 1 : i32
    %0 = arith.subi %arg1, %c1_i32 : i32
    %c0_i32 = arith.constant 0 : i32
    %1 = arith.maxsi %0, %c0_i32 : i32
    %c0_i32_0 = arith.constant 0 : i32
    %c0_i32_1 = arith.constant 0 : i32
    return %arg0, %1, %c0_i32_0 : i32, i32, i32
  }
  func.func @transform_2(%arg0: i32, %arg1: i32) -> (i32, i32, i32) {
    %c0_i32 = arith.constant 0 : i32
    %c0_i32_0 = arith.constant 0 : i32
    return %arg0, %arg1, %c0_i32 : i32, i32, i32
  }
}

</mosaic_0001>

<bundles_post_ra>
// kernel: tpu_custom_call.1
= control target key start
LH: loop header
LB: loop body
LE: loop exit
PB: predicated region body
PF: predicated region fallthrough
CT: control target
= control target key end

     0   :  { %7 = vsyncpa [#allocation3], 0  ;;  %s883_s0 = inlined_call_operand.vmem [shape: f32[2,128,128], index: 0, kind: input, shape index: {}]   ;;  %s884_s1 = inlined_call_operand.vmem [shape: f32[2,129,128], index: 1, kind: input, shape index: {}]   ;;  %s885_s2 = inlined_call_operand.hbm [shape: f32[2,256,128], index: 2, kind: output, shape index: {}]  }
   0x1   :  { %9 = vsyncpa [#allocation3 + $0x1], 0  ;;  %s662_s9 = smov 0   ;;  %s664_s10 = smov 0  }
   0x2   :  { %s666_s11 = smov 0   ;;  %s668_s12 = smov 0  }
   0x3   :  { %s670_s13 = smov 0   ;;  %s672_s14 = smov 0  }
   0x4   :  { %s674_s15 = smov 0   ;;  %s676_s16 = smov 0  }
   0x5 LB: > { %890 = sst [smem:[#allocation5_spill]] %s638_s15  ;;  %s452_s17 = sadd.s32 4294967295, %s642_s16   ;;  %s642_s16 = sphi %s676_s16, %s15_s16   ;;  %s638_s15 = sphi %s674_s15, %s898_s15   ;;  %s634_s14 = sphi %s672_s14, %s903_s14   ;;  %s630_s13 = sphi %s670_s13, %s896_s13   ;;  %s626_s12 = sphi %s668_s12, %s902_s12   ;;  %s622_s11 = sphi %s666_s11, %s901_s11   ;;  %s618_s10 = sphi %s664_s10, %s900_s10   ;;  %s614_s9 = sphi %s662_s9, %s899_s9  }
   0x6   : > { %s453_s18 = sadd.s32 4294967294, %s642_s16   ;;  %s24_s19 = sadd.s32 1, %s634_s14 }
   0x7   : > { %p25_p0 = scmp.ge.s32.totalorder %s24_s19, 2  ;;  %s27_s20 = sadd.s32 1, %s638_s15 }
   0x8   : > { %p112_p1 = scmp.ne.s32.totalorder %s622_s11, %s618_s10  ;;  %p113_p2 = scmp.eq.s32.totalorder %s452_s17, 3 }
   0x9   : > { %s905_s19 = smov (%p25_p0, %s24_s19), 0  ;;  %s907_s20 = smov (!%p25_p0, %s27_s20), %s638_s15 }
   0xa   : > { %891 = sst [smem:[#allocation6_spill]] %s905_s19  ;;  %s98_s21 = ssub.s32 %s634_s14, %s905_s19 }
   0xb   : > { %p713_p3 = por %p113_p2, %p112_p1  ;;  %p29_p4 = scmp.ge.s32.totalorder %s907_s20, 2 }
   0xc   : > { %p118_p5 = scmp.ne.s32.totalorder %s618_s10, %s614_s9  ;;  %p119_p6 = scmp.eq.s32.totalorder %s453_s18, 3 }
   0xd   : > { %p458_p7 = scmp.ge.s32.totalorder %s642_s16, 1  ;;  %s909_s20 = smov (%p29_p4, %s907_s20), 0 }
   0xe   : > { %893 = sst [smem:[#allocation7_spill]] %s909_s20  ;;  %p722_p8 = por %p119_p6, %p118_p5 }
   0xf   : > { %p181_p9 = scmp.lt.s32.totalorder %s642_s16, 5  ;;  %s97_s24 = ssub.s32 %s638_s15, %s909_s20 }
  0x10   : > { %s102_s25 = sadd.s32 1, %s622_s11  ;;  %s99_s26 = sor.u32 %s98_s21, %s97_s24 }
  0x11   : > { %p182_p10 = pnand %p458_p7, %p181_p9  ;;  %p100_p11 = scmp.eq.s32.totalorder %s99_s26, 0 }
  0x12   : > { %s886_s28 = sand.u32 (!%p182_p10), 1, %s618_s10   ;;  %p225_p12 = scmp.lt.s32.totalorder (!%p182_p10), %s626_s12, 0 }
  0x13   : > { %s731_s27 = scalar_select %p100_p11, %s622_s11, %s102_s25  }
  0x14   : > { %185 = sbr.rel (%p182_p10) target bundleno = 82 (0x52), region = 28  ;;  %s459_s29 = sshll.u32 (!%p182_p10), %s886_s28, 7 }
  0x15   : > { %p228_p13 = scmp.lt.s32.totalorder (!%p182_p10), %s630_s13, 1  ;;  %s463_s30 = sadd.s32 (!%p182_p10), 4294967295, %s626_s12 }
  0x16   : > { %p240_p0 = scmp.gt.s32.totalorder (!%p182_p10), %s463_s30, 0  ;;  %s751_s15 = scalar_lea.vmem (!%p182_p10), [#allocation2], %s459_s29 }
  0x17   : > { %p466_p4 = scmp.ge.s32.totalorder (!%p182_p10), %s626_s12, 1 }
  0x1b   : > { %s226_s3 = scalar_select %p225_p12, %s626_s12, 0 }
  0x1c   : > { %s229_s4 = scalar_select %p228_p13, %s630_s13, 1 }
  0x1d   : > { %s460_s5 = sshll.u32 %s226_s3, 4  ;;  %s911_s30 = smov (!%p240_p0, %s463_s30), 0 }
  0x1e   : > { %p230_p1 = scmp.lt.s32.totalorder %s460_s5, 15  ;;  %s461_s6 = sshll.u32 %s229_s4, 4 }
  0x1f   : > { %s464_s7 = sshll.u32 %s911_s30, 4  ;;  %s474_s18 = smul.u32 17, %s229_s4 }
  0x20   : > { %s913_s5 = smov (!%p230_p1, %s460_s5), 15  ;;  %p249_p2 = scmp.lt.s32.totalorder %s464_s7, 16 }
  0x21   : > { %s233_s8 = sadd.s32 %s461_s6, %s913_s5  ;;  %267 = sbr.rel (%p466_p4) target bundleno = 45 (0x2d), region = 32 }
  0x22   : > { %s462_s17 = sshll.u32 %s233_s8, 3  ;;  %s915_s7 = smov (!%p249_p2, %s464_s7), 16 }
  0x23   : > { %s744_s25 = scalar_lea.vmem %s883_s0, %s462_s17  ;;  %s252_s26 = sadd.s32 %s474_s18, %s915_s7 }
  0x24   : > { %s465_s28 = sshll.u32 %s252_s26, 3  ;;  %v268_v0 = vld [vmem:[%s744_s25] sm:$0xff] (!%p466_p4)  ;;  %v269_v1 = vld [vmem:[%s744_s25 + $0x8] sm:$0xff] (!%p466_p4)  ;;  %v270_v2 = vld [vmem:[%s744_s25 + $0x10] sm:$0xff] (!%p466_p4) }
  0x25   : > { %s749_s19 = scalar_lea.vmem %s884_s1, %s465_s28  ;;  %284 = vst [vmem:[%s751_s15] sm:$0xff] (!%p466_p4), %v268_v0  ;;  %285 = vst [vmem:[%s751_s15 + $0x8] sm:$0xff] (!%p466_p4), %v269_v1  ;;  %v271_v3 = vld [vmem:[%s744_s25 + $0x18] sm:$0xff] (!%p466_p4)  ;;  %v272_v4 = vld [vmem:[%s744_s25 + $0x20] sm:$0xff] (!%p466_p4) }
  0x26   : > { %286 = vst [vmem:[%s751_s15 + $0x10] sm:$0xff] (!%p466_p4), %v270_v2  ;;  %v273_v5 = vld [vmem:[%s744_s25 + $0x28] sm:$0xff] (!%p466_p4)  ;;  %287 = vst [vmem:[%s751_s15 + $0x18] sm:$0xff] (!%p466_p4), %v271_v3  ;;  %v274_v6 = vld [vmem:[%s744_s25 + $0x30] sm:$0xff] (!%p466_p4) }
  0x27   : > { %288 = vst [vmem:[%s751_s15 + $0x20] sm:$0xff] (!%p466_p4), %v272_v4  ;;  %289 = vst [vmem:[%s751_s15 + $0x28] sm:$0xff] (!%p466_p4), %v273_v5  ;;  %v275_v7 = vld [vmem:[%s744_s25 + $0x38] sm:$0xff] (!%p466_p4)  ;;  %v276_v8 = vld [vmem:[%s744_s25 + $0x40] sm:$0xff] (!%p466_p4) }
  0x28   : > { %290 = vst [vmem:[%s751_s15 + $0x30] sm:$0xff] %v274_v6  ;;  %291 = vst [vmem:[%s751_s15 + $0x38] sm:$0xff] %v275_v7  ;;  %v277_v9 = vld [vmem:[%s744_s25 + $0x48] sm:$0xff]  ;;  %v278_v10 = vld [vmem:[%s744_s25 + $0x50] sm:$0xff] }
  0x29   : > { %292 = vst [vmem:[%s751_s15 + $0x40] sm:$0xff] %v276_v8  ;;  %v279_v11 = vld [vmem:[%s744_s25 + $0x58] sm:$0xff]  ;;  %293 = vst [vmem:[%s751_s15 + $0x48] sm:$0xff] %v277_v9  ;;  %v280_v12 = vld [vmem:[%s744_s25 + $0x60] sm:$0xff] }
  0x2a   : > { %294 = vst [vmem:[%s751_s15 + $0x50] sm:$0xff] %v278_v10  ;;  %295 = vst [vmem:[%s751_s15 + $0x58] sm:$0xff] %v279_v11  ;;  %v281_v13 = vld [vmem:[%s744_s25 + $0x68] sm:$0xff]  ;;  %v282_v14 = vld [vmem:[%s744_s25 + $0x70] sm:$0xff] }
  0x2b   : > { %296 = vst [vmem:[%s751_s15 + $0x60] sm:$0xff] %v280_v12  ;;  %297 = vst [vmem:[%s751_s15 + $0x68] sm:$0xff] %v281_v13  ;;  %v283_v15 = vld [vmem:[%s744_s25 + $0x78] sm:$0xff] }
  0x2c   : > { %298 = vst [vmem:[%s751_s15 + $0x70] sm:$0xff] %v282_v14  ;;  %299 = vst [vmem:[%s751_s15 + $0x78] sm:$0xff] %v283_v15 }
  0x2d PF: > { %p467_p5 = scmp.lt.s32.totalorder %s626_s12, 1 }
  0x2e   : > { %v304_v16 = vld [vmem:[%s749_s19] sm:$0xff] (!%p467_p5)  ;;  %v305_v17 = vld [vmem:[%s749_s19 + $0x8] sm:$0xff] (!%p467_p5)  ;;  %v306_v18 = vld [vmem:[%s749_s19 + $0x10] sm:$0xff] (!%p467_p5) }
  0x2f   : > { %303 = sbr.rel (%p467_p5) target bundleno = 55 (0x37), region = 36  ;;  %320 = vst [vmem:[%s751_s15] sm:$0xff] (!%p467_p5), %v304_v16  ;;  %321 = vst [vmem:[%s751_s15 + $0x8] sm:$0xff] (!%p467_p5), %v305_v17  ;;  %v307_v19 = vld [vmem:[%s749_s19 + $0x18] sm:$0xff] (!%p467_p5)  ;;  %v308_v20 = vld [vmem:[%s749_s19 + $0x20] sm:$0xff] (!%p467_p5) }
  0x30   : > { %322 = vst [vmem:[%s751_s15 + $0x10] sm:$0xff] (!%p467_p5), %v306_v18  ;;  %v309_v21 = vld [vmem:[%s749_s19 + $0x28] sm:$0xff] (!%p467_p5)  ;;  %323 = vst [vmem:[%s751_s15 + $0x18] sm:$0xff] (!%p467_p5), %v307_v19  ;;  %v310_v22 = vld [vmem:[%s749_s19 + $0x30] sm:$0xff] (!%p467_p5) }
  0x31   : > { %324 = vst [vmem:[%s751_s15 + $0x20] sm:$0xff] (!%p467_p5), %v308_v20  ;;  %325 = vst [vmem:[%s751_s15 + $0x28] sm:$0xff] (!%p467_p5), %v309_v21  ;;  %v311_v23 = vld [vmem:[%s749_s19 + $0x38] sm:$0xff] (!%p467_p5)  ;;  %v312_v24 = vld [vmem:[%s749_s19 + $0x40] sm:$0xff] (!%p467_p5) }
  0x32   : > { %326 = vst [vmem:[%s751_s15 + $0x30] sm:$0xff] (!%p467_p5), %v310_v22  ;;  %327 = vst [vmem:[%s751_s15 + $0x38] sm:$0xff] (!%p467_p5), %v311_v23  ;;  %v313_v25 = vld [vmem:[%s749_s19 + $0x48] sm:$0xff] (!%p467_p5)  ;;  %v314_v26 = vld [vmem:[%s749_s19 + $0x50] sm:$0xff] (!%p467_p5) }
  0x33   : > { %328 = vst [vmem:[%s751_s15 + $0x40] sm:$0xff] (!%p467_p5), %v312_v24  ;;  %v315_v27 = vld [vmem:[%s749_s19 + $0x58] sm:$0xff] (!%p467_p5)  ;;  %329 = vst [vmem:[%s751_s15 + $0x48] sm:$0xff] (!%p467_p5), %v313_v25  ;;  %v316_v28 = vld [vmem:[%s749_s19 + $0x60] sm:$0xff] (!%p467_p5) }
  0x34   : > { %330 = vst [vmem:[%s751_s15 + $0x50] sm:$0xff] (!%p467_p5), %v314_v26  ;;  %331 = vst [vmem:[%s751_s15 + $0x58] sm:$0xff] (!%p467_p5), %v315_v27  ;;  %v317_v29 = vld [vmem:[%s749_s19 + $0x68] sm:$0xff] (!%p467_p5)  ;;  %v318_v30 = vld [vmem:[%s749_s19 + $0x70] sm:$0xff] (!%p467_p5) }
  0x35   : > { %332 = vst [vmem:[%s751_s15 + $0x60] sm:$0xff] (!%p467_p5), %v316_v28  ;;  %333 = vst [vmem:[%s751_s15 + $0x68] sm:$0xff] (!%p467_p5), %v317_v29  ;;  %v319_v31 = vld [vmem:[%s749_s19 + $0x78] sm:$0xff] (!%p467_p5) }
  0x36   : > { %334 = vst [vmem:[%s751_s15 + $0x70] sm:$0xff] %v318_v30  ;;  %335 = vst [vmem:[%s751_s15 + $0x78] sm:$0xff] %v319_v31 }
  0x37 PF: > { %s469_s20 = sshll.u32 %s626_s12, 4  ;;  %s470_s28 = sshll.u32 %s630_s13, 5 }
  0x38   : > { %s352_s29 = sshll.u32 %s751_s15, 4  ;;  %s349_s30 = sadd.s32 %s470_s28, %s469_s20  ;;  %s822_s29 = int_to_ptr.vmem [resolvable:$true] %s352_s29 }
  0x39   : > { %s471_s4 = sshll.u32 %s349_s30, 7  ;;  %s895_s7 = sand.u32 1, %s618_s10  }
  0x3a   : > { %s827_s19 = scalar_lea.hbm %s885_s2, %s471_s4  ;;  %s831_s8 = scalar_lea.sflag [#allocation3], %s895_s7 }
  0x3b   : > { %s548_s17 = scalar_lea.vmem %s822_s29, 2048  ;;  %s644_s12 = smov [#allocation2]  }
  0x3c   : > { %p549_p6 = scmp.ne.s32.totalorder %s822_s29, %s548_s17  ;;  %s552_s13 = sshll.u32 %s644_s12, 4  ;;  %s553_s13 = int_to_ptr.vmem [resolvable:$false] %s552_s13 }
  0x3d   : > { %s554_s15 = scalar_lea.vmem %s553_s13, 4096  ;;  %p555_p10 = scmp.lt.s32.totalorder %s822_s29, %s553_s13 }
  0x3e   : > { %p550_p7 = pnand %p549_p6, %p713_p3  ;;  %p556_p11 = scmp.lt.s32.totalorder %s554_s15, %s548_s17 }
  0x40   : > { %p551_p9 = pneg %p550_p7  ;;  %p557_p12 = por %p556_p11, %p555_p10 }
  0x42   : > { %p558_p13 = pnand %p557_p12, %p551_p9 }
  0x44   : > { %561 = shalt.err (!%p558_p13)
}
  0x45   : > { %s562_s18 = scalar_lea.hbm %s827_s19, 2048  ;;  %s566_s25 = scalar_lea.hbm %s885_s2, 8192 }
  0x46   : > { %p563_p0 = scmp.ne.s32.totalorder %s827_s19, %s562_s18  ;;  %p567_p4 = scmp.lt.u32.totalorder %s827_s19, %s885_s2 }
  0x47   : > { %p568_p5 = scmp.lt.u32.totalorder %s566_s25, %s562_s18  ;;  %p570_p7 = scmp.lt.u32.totalorder %s562_s18, %s827_s19 }
  0x48   : > { %p564_p1 = pnand %p563_p0, %p713_p3 }
  0x49   : > { %p569_p6 = por %p568_p5, %p567_p4 }
  0x4a   : > { %p565_p2 = pneg %p564_p1 }
  0x4b   : > { %p571_p9 = por %p570_p7, %p569_p6 }
  0x4d   : > { %p572_p10 = pnand %p571_p9, %p565_p2 }
  0x4f   : > { %575 = shalt.err (!%p572_p10)
}
  0x50   : > { %s645_s20 = smov 128   ;;  %s646_s28 = smov 8  }
  0x51   : > { %475 = dma.vmem_to_hbm [thread:$0]  (%p713_p3), %s822_s29, 2048, %s827_s19, %s831_s8, %s645_s20, %s645_s20, %s646_s28  }
  0x52 PF: > { %p481_p11 = scmp.ge.s32.totalorder %s642_s16, 2  ;;  %s367_s30 = sand.u32 1, %s614_s9  }
  0x53   : > { %s368_s4 = scalar_lea.sflag [#allocation3], %s367_s30 }
  0x54   : > { %p478_p12 = pnand %p481_p11, %p722_p8 }
  0x56   : > { %609 = dma.done.wait (!%p478_p12), %s368_s4, 2048  }
  0x57   : > { %611 = vsyncadd (!%p478_p12), %s368_s4, 4294965248  ;;  %s15_s16 = sadd.s32 1, %s642_s16   ;;  %s896_s13 = sld [smem:[#allocation5_spill]] }
  0x58   : > { %p12_p13 = scmp.ge.s32.totalorder %s15_s16, 6   ;;  %s897_s22 = sld [smem:[#allocation6_spill]] }
  0x59   : > { %s898_s15 = sld [smem:[#allocation7_spill]]  ;;  %s899_s9 = smov %s618_s10 }
  0x5a   : > { %s900_s10 = smov %s622_s11  ;;  %s901_s11 = smov %s731_s27 }
  0x5b   : > { %s902_s12 = smov %s634_s14  ;;  %14 = sbr.rel (!%p12_p13) target bundleno = 5 (0x5), region = 74 }
  0x5e   : > { %s903_s14 = smov %s897_s22 }
  0x62   :  { %373 = vsyncpa [#allocation3], 1 }
  0x63   :  { %375 = vsyncpa [#allocation3 + $0x1], 1 }

</bundles_post_ra>
